<compile_context>
chip_gen: v7x
topology: tpu7x:2x2x1
jax: 0.10.0
libtpu: 0.0.40
codegen_flags: <defaults>
</compile_context>

<pallas_src>
import functools

import jax
import jax.numpy as jnp
from jax import lax
from jax.experimental import pallas as pl
from jax.experimental.pallas import tpu as pltpu


def _round_up(v, m):
    return -(-v // m) * m


def _full_spec(shape):
    nd = len(shape)
    return pl.BlockSpec(shape, lambda *_: (0,) * nd)


# ---------------------------------------------------------------------------
# Generation-aware VMEM budgets.
# ---------------------------------------------------------------------------
def _vmem_capacity_bytes():
    try:
        return int(pltpu.get_tpu_info().vmem_capacity_bytes)
    except Exception:
        pass
    try:
        kind = jax.devices()[0].device_kind.lower()
        if "v7" in kind:
            return 64 * 1024 * 1024
        if any(t in kind for t in ("v4", "v5", "v6")):
            return 128 * 1024 * 1024
    except Exception:
        pass
    return 64 * 1024 * 1024          # conservative default (v7x-sized)


def _vmem_budgets():
    cap = _vmem_capacity_bytes()
    if cap >= 96 * 1024 * 1024:       # v5e / v6e class: 128 MiB physical VMEM
        return 96 * 1024 * 1024, 64 * 1024 * 1024
    return 44 * 1024 * 1024, 28 * 1024 * 1024    # v7x class: 64 MiB per TC


def _select_tile(n8, heads, out_pad, tile_m, budget):
    # Resident (TM-independent) buffers in the attention kernel:
    #   block-diag features (bf16), a_src (f32), bias, slack.
    resident = heads * n8 * out_pad * 2 + heads * n8 * 4 + out_pad * 4 + (1 << 16)
    # Per-dst-row cost: double-buffered fused bf16 streams (per head), f32
    # logits/exp temporaries (reused across heads), bf16 alphas (+concat),
    # double-buffered output tile, a_dst stream.
    per_row = n8 * (8 * heads + 8) + out_pad * 8 + heads * 8
    cap_tm = max(8, ((budget - resident) // max(per_row, 1)) // 8 * 8)
    tm = max(8, min(_round_up(max(tile_m, 8), 8), cap_tm, _round_up(n8, 8)))
    # Keep tm a divisor of 128 (or a multiple of 128) so n_pad stays 128-aligned
    # (lane-dense streamed tiles and clean alpha concatenation offsets).
    if tm >= 128:
        return (tm // 128) * 128
    d = 8
    while d * 2 <= tm:
        d *= 2
    return d


# ---------------------------------------------------------------------------
# Per-layer projection kernel (runs once): feat, a_src, a_dst, block-diag F.
# ---------------------------------------------------------------------------
def _proj_kernel(x_ref, w_ref, asrc_ref, adst_ref,
                 fblk_ref, asrc_out_ref, adst_out_ref, *, heads, out_ch, n_pad):
    x = x_ref[...]
    if x.dtype != jnp.float32:
        x = x.astype(jnp.float32)
    feat = jnp.dot(x, w_ref[...], preferred_element_type=jnp.float32)   # [N, H*C]
    # Batched attention projections: one MXU push each against block-"diagonal"
    # attention matrices built in glue (instead of 2*heads per-tile pushes).
    asrc_out_ref[...] = lax.dot_general(
        asrc_ref[...], feat, (((1,), (1,)), ((), ())),
        preferred_element_type=jnp.float32)                              # [H, N]
    adst_out_ref[...] = lax.dot_general(
        feat, adst_ref[...], (((1,), (1,)), ((), ())),
        preferred_element_type=jnp.float32)                              # [N, H]
    # Block-diagonal, lane-padded (128) bf16 aggregation matrix: rows
    # h*N:(h+1)*N carry head h's features in columns h*C:(h+1)*C, zeros
    # elsewhere, so the attention kernel does one wide matmul and one
    # unmasked 128-lane store.
    feat_bf = feat.astype(jnp.bfloat16)
    fblk_ref[...] = jnp.zeros(fblk_ref.shape, jnp.bfloat16)
    for h in range(heads):
        fblk_ref[h * n_pad:(h + 1) * n_pad, h * out_ch:(h + 1) * out_ch] = (
            feat_bf[:, h * out_ch:(h + 1) * out_ch])
    # TODO(synk): for very large N, tile this projection over node blocks instead
    # of holding the full [N, H*C] activation in VMEM.


def gat_project(x, w, asrc_blk, adst_blk, *, heads, out_ch, out_pad, vmem_limit):
    n_pad = x.shape[0]
    kernel = functools.partial(_proj_kernel, heads=heads, out_ch=out_ch,
                               n_pad=n_pad)
    out_shape = (
        jax.ShapeDtypeStruct((heads * n_pad, out_pad), jnp.bfloat16),   # F_blk
        jax.ShapeDtypeStruct((heads, n_pad), jnp.float32),              # a_src
        jax.ShapeDtypeStruct((n_pad, heads), jnp.float32),              # a_dst
    )
    return pl.pallas_call(
        kernel,
        out_shape=out_shape,
        grid=(1,),
        in_specs=[_full_spec(a.shape) for a in (x, w, asrc_blk, adst_blk)],
        out_specs=[_full_spec(s.shape) for s in out_shape],
        compiler_params=pltpu.CompilerParams(
            dimension_semantics=("arbitrary",), vmem_limit_bytes=vmem_limit),
    )(x, w, asrc_blk, adst_blk)


# ---------------------------------------------------------------------------
# Attention kernel: dense masked multi-head softmax, tiled over dst nodes.
# ---------------------------------------------------------------------------
def _attn_kernel(adst_ref, asrc_ref, fused_ref, fblk_ref, bias_ref, out_ref, *,
                 heads, apply_relu):
    alphas = []
    for h in range(heads):
        # fused_ref[h] already holds edge_attr*ecoef[h] + (mask-1)*1e30 in bf16;
        # adding the mask before leaky_relu is exact (masked logits stay ~-1e30
        # and underflow to 0 after the max-subtracted exp).
        logits = (adst_ref[:, h:h + 1] + asrc_ref[h:h + 1, :]
                  + fused_ref[h].astype(jnp.float32))                   # [TM, N]
        logits = jnp.where(logits >= 0, logits, 0.2 * logits)           # leaky_relu
        m = jnp.max(logits, axis=-1, keepdims=True)
        p = jnp.exp(logits - m)
        denom = jnp.sum(p, axis=-1, keepdims=True)
        alphas.append((p * pl.reciprocal(denom, approx=True)).astype(jnp.bfloat16))
    # TODO(synk): for very large graphs, tile the source axis too and use an
    # online (flash-style) softmax so the [TM, N] logits never materialize.
    a_cat = alphas[0] if heads == 1 else jnp.concatenate(alphas, axis=-1)
    # Single wide aggregation matmul against the block-diagonal feature matrix:
    # [TM, heads*N] x [heads*N, out_pad] bf16 with f32 accumulate; padded output
    # lanes come out as exact zeros from the zero columns of F_blk.
    res = jnp.dot(a_cat, fblk_ref[...], preferred_element_type=jnp.float32)
    res = res + bias_ref[...]
    if apply_relu:
        res = jnp.maximum(res, 0.0)
    out_ref[...] = res.astype(out_ref.dtype)       # one lane-dense 128-wide store


def gat_attention(a_dst, a_src, fused_bias, fblk, bias, *, heads, out_pad,
                  apply_relu, out_dtype, tile_m, vmem_limit):
    n_pad = a_dst.shape[0]
    tm = tile_m
    assert n_pad % tm == 0 and tm % 8 == 0
    kernel = functools.partial(_attn_kernel, heads=heads, apply_relu=apply_relu)
    in_specs = [
        pl.BlockSpec((tm, heads), lambda i: (i, 0)),            # a_dst tile
        pl.BlockSpec((heads, n_pad), lambda i: (0, 0)),         # a_src (resident)
        pl.BlockSpec((heads, tm, n_pad), lambda i: (0, i, 0)),  # fused bf16 stream
        pl.BlockSpec(fblk.shape, lambda i: (0, 0)),             # F_blk (resident)
        pl.BlockSpec(bias.shape, lambda i: (0, 0)),             # bias (resident)
    ]
    return pl.pallas_call(
        kernel,
        out_shape=jax.ShapeDtypeStruct((n_pad, out_pad), out_dtype),
        grid=(n_pad // tm,),
        in_specs=in_specs,
        out_specs=pl.BlockSpec((tm, out_pad), lambda i: (i, 0)),
        compiler_params=pltpu.CompilerParams(
            dimension_semantics=("parallel",),                   # megacore on v7x
            vmem_limit_bytes=vmem_limit),
    )(a_dst, a_src, fused_bias, fblk, bias)


# ---------------------------------------------------------------------------
# Pool + MLP head kernel: global_mean_pool -> Linear -> ReLU -> LayerNorm -> Linear
# ---------------------------------------------------------------------------
def _head_kernel(pool_ref, x_ref, w1_ref, b1_ref, gamma_ref, beta_ref,
                 w2_ref, b2_ref, out_ref):
    g = jnp.dot(pool_ref[...], x_ref[...],
                preferred_element_type=jnp.float32)                     # [B, Hpad]
    h = jnp.dot(g, w1_ref[...], preferred_element_type=jnp.float32) + b1_ref[...]
    h = jnp.maximum(h, 0.0)
    mu = jnp.mean(h, axis=-1, keepdims=True)
    var = jnp.mean((h - mu) ** 2, axis=-1, keepdims=True)
    hn = (h - mu) * lax.rsqrt(var + jnp.float32(1e-5))
    hn = hn * gamma_ref[...] + beta_ref[...]
    out_ref[...] = (jnp.dot(hn, w2_ref[...],
                            preferred_element_type=jnp.float32) + b2_ref[...])


def mlp_head(pool, x, w1, b1, gamma, beta, w2, b2, *, vmem_limit):
    b = pool.shape[0]
    out_ch = w2.shape[1]
    args = (pool, x, w1, b1, gamma, beta, w2, b2)
    return pl.pallas_call(
        _head_kernel,
        out_shape=jax.ShapeDtypeStruct((b, out_ch), jnp.float32),
        grid=(1,),
        in_specs=[_full_spec(a.shape) for a in args],
        out_specs=_full_spec((b, out_ch)),
        compiler_params=pltpu.CompilerParams(
            dimension_semantics=("arbitrary",), vmem_limit_bytes=vmem_limit),
    )(*args)


# ---------------------------------------------------------------------------
# Glue: parameters, dense adjacency with self loops (fill_value='mean'), pooling.
# ---------------------------------------------------------------------------
def init_params(key, in_ch, hidden, out_ch, heads):
    keys = jax.random.split(key, 16)

    def nrm(k, shape, scale=0.1):
        return scale * jax.random.normal(k, shape, dtype=jnp.float32)

    p = {}
    # gat1: GATConv(in_ch, hidden, heads, concat=True, edge_dim=1)
    p["w1"] = nrm(keys[0], (in_ch, heads * hidden))
    p["att_src1"] = nrm(keys[1], (heads, hidden))
    p["att_dst1"] = nrm(keys[2], (heads, hidden))
    p["w_edge1"] = nrm(keys[3], (1, heads * hidden))
    p["att_edge1"] = nrm(keys[4], (heads, hidden))
    p["bias1"] = nrm(keys[5], (1, heads * hidden))
    # gat2: GATConv(hidden*heads, hidden, heads=1, concat=True, edge_dim=1)
    p["w2"] = nrm(keys[6], (heads * hidden, hidden))
    p["att_src2"] = nrm(keys[7], (1, hidden))
    p["att_dst2"] = nrm(keys[8], (1, hidden))
    p["w_edge2"] = nrm(keys[9], (1, hidden))
    p["att_edge2"] = nrm(keys[10], (1, hidden))
    p["bias2"] = nrm(keys[11], (1, hidden))
    # lin head: Linear -> ReLU -> LayerNorm -> Linear
    p["lin_w1"] = nrm(keys[12], (hidden, hidden))
    p["lin_b1"] = nrm(keys[13], (1, hidden))
    p["ln_gamma"] = jnp.ones((1, hidden), jnp.float32)
    p["ln_beta"] = jnp.zeros((1, hidden), jnp.float32)
    p["lin_w2"] = nrm(keys[14], (hidden, out_ch))
    p["lin_b2"] = nrm(keys[15], (1, out_ch))
    return p


def edge_coef(w_edge, att_edge, heads, hidden):
    # alpha_edge[e, h] = edge_attr[e] * <w_edge[h,:], att_edge[h,:]>  (edge_dim=1)
    we = w_edge.reshape(heads, hidden)
    return jnp.sum(we * att_edge, axis=-1)[None, :].astype(jnp.float32)  # [1, heads]


def block_att(att):
    # [heads, C] -> [heads, heads*C] with att[h] placed in columns h*C:(h+1)*C.
    heads, c = att.shape
    eye = jnp.eye(heads, dtype=att.dtype)
    return (eye[:, :, None] * att[None, :, :]).reshape(heads, heads * c)


def densify(edge_index, edge_attr, n_pad):
    # PyG: remove self loops, then add self loops with edge_attr = per-dst mean.
    src, dst = edge_index[0], edge_index[1]
    valid = (src != dst).astype(jnp.float32)
    ea = edge_attr[:, 0] * valid
    mask = jnp.zeros((n_pad, n_pad), jnp.float32).at[dst, src].add(valid)
    eden = jnp.zeros((n_pad, n_pad), jnp.float32).at[dst, src].add(ea)
    cnt = jnp.zeros((n_pad,), jnp.float32).at[dst].add(valid)
    ssum = jnp.zeros((n_pad,), jnp.float32).at[dst].add(ea)
    loop_attr = ssum / jnp.maximum(cnt, 1.0)
    diag = jnp.arange(n_pad)
    mask = mask.at[diag, diag].set(1.0)
    eden = eden.at[diag, diag].set(loop_attr)
    return mask, eden


def gat_model(params, x, edge_index, edge_attr, batch_idx, num_graphs, *,
              heads, hidden, tile_m=256):
    n_real = x.shape[0]
    n8 = _round_up(n_real, 8)
    out_pad1 = _round_up(heads * hidden, 128)   # lane-dense layer-1 output width
    out_pad2 = _round_up(hidden, 128)           # lane-dense layer-2 output width

    vmem_limit, budget = _vmem_budgets()
    tm = _select_tile(n8, heads, out_pad1, tile_m, budget)
    n_pad = _round_up(n_real, tm if tm >= 128 else 128)
    pad = n_pad - n_real

    xp = jnp.pad(x, ((0, pad), (0, 0))) if pad else x
    mask, eattr = densify(edge_index, edge_attr, n_pad)
    mask_bias = (mask - 1.0) * jnp.float32(1e30)

    # Pre-fuse the per-head edge score (edge_attr * ecoef[h]) with the additive
    # adjacency mask into a single bf16 stream per head -- the only O(N^2) HBM
    # traffic seen by the kernels (2 B/elem per head).
    ecoef1 = edge_coef(params["w_edge1"], params["att_edge1"], heads, hidden)
    ecoef2 = edge_coef(params["w_edge2"], params["att_edge2"], 1, hidden)
    fused1 = (mask_bias[None, :, :]
              + eattr[None, :, :] * ecoef1[0][:, None, None]).astype(jnp.bfloat16)
    fused2 = (mask_bias + eattr * ecoef2[0, 0]).astype(jnp.bfloat16)[None, :, :]

    asrc1, adst1 = block_att(params["att_src1"]), block_att(params["att_dst1"])
    asrc2, adst2 = block_att(params["att_src2"]), block_att(params["att_dst2"])
    bias1 = jnp.pad(params["bias1"], ((0, 0), (0, out_pad1 - heads * hidden)))
    bias2 = jnp.pad(params["bias2"], ((0, 0), (0, out_pad2 - hidden)))

    # ---- gat1 + ReLU: project once, then dst-tiled masked attention ----
    fblk1, a_src1, a_dst1 = gat_project(
        xp, params["w1"], asrc1, adst1,
        heads=heads, out_ch=hidden, out_pad=out_pad1, vmem_limit=vmem_limit)
    h1 = gat_attention(a_dst1, a_src1, fused1, fblk1, bias1,
                       heads=heads, out_pad=out_pad1, apply_relu=True,
                       out_dtype=jnp.bfloat16, tile_m=tm, vmem_limit=vmem_limit)

    # ---- gat2 (heads=1): zero-padded W2 rows cancel h1's zero lane padding ----
    w2p = jnp.pad(params["w2"], ((0, out_pad1 - heads * hidden), (0, 0)))
    fblk2, a_src2, a_dst2 = gat_project(
        h1, w2p, asrc2, adst2,
        heads=1, out_ch=hidden, out_pad=out_pad2, vmem_limit=vmem_limit)
    h2 = gat_attention(a_dst2, a_src2, fused2, fblk2, bias2,
                       heads=1, out_pad=out_pad2, apply_relu=False,
                       out_dtype=jnp.float32, tile_m=tm, vmem_limit=vmem_limit)

    # ---- global_mean_pool as a [B, N_pad] averaging matrix (pad nodes weight 0) ----
    counts = jnp.zeros((num_graphs,), jnp.float32).at[batch_idx].add(1.0)
    bi = jnp.pad(batch_idx, (0, pad), constant_values=-1) if pad else batch_idx
    pool = (bi[None, :] == jnp.arange(num_graphs)[:, None]).astype(jnp.float32)
    pool = pool / jnp.maximum(counts, 1.0)[:, None]

    w1p = jnp.pad(params["lin_w1"], ((0, out_pad2 - hidden), (0, 0)))
    out = mlp_head(pool, h2, w1p, params["lin_b1"],
                   params["ln_gamma"], params["ln_beta"],
                   params["lin_w2"], params["lin_b2"], vmem_limit=vmem_limit)
    return out, edge_attr


if __name__ == "__main__":
    in_ch, hidden, out_ch, heads = 8, 32, 8, 2
    nodes_per_graph, num_graphs = 8, 2
    num_nodes = nodes_per_graph * num_graphs

    key = jax.random.PRNGKey(0)
    kx, ke, kp = jax.random.split(key, 3)

    x = jax.random.normal(kx, (num_nodes, in_ch), dtype=jnp.float32)

    # Deterministic simple graph (no duplicate edges, no self loops).
    edges = []
    for g in range(num_graphs):
        base = g * nodes_per_graph
        for i in range(nodes_per_graph):
            for d in (1, 2, 3):
                edges.append((base + i, base + (i + d) % nodes_per_graph))
    edge_index = jnp.array(edges, dtype=jnp.int32).T   # [2, E], row0=src, row1=dst
    edge_attr = jax.random.uniform(ke, (edge_index.shape[1], 1), dtype=jnp.float32)
    batch_idx = jnp.repeat(jnp.arange(num_graphs, dtype=jnp.int32), nodes_per_graph)

    params = init_params(kp, in_ch, hidden, out_ch, heads)

    # tile_m=8 -> several dst tiles on this tiny demo, exercising the pipelined grid.
    out, ea = gat_model(params, x, edge_index, edge_attr, batch_idx, num_graphs,
                        heads=heads, hidden=hidden, tile_m=8)
    jax.block_until_ready(out)
    assert out.shape == (num_graphs, out_ch)
    assert ea.shape == edge_attr.shape
    assert bool(jnp.all(jnp.isfinite(out)))
    print("KERNEL_OK")
</pallas_src>

<mosaic_0001>
module attributes {stable_mosaic.version = 11 : i64} {
  func.func @_proj_kernel(%arg0: i32, %arg1: memref<128x8xf32, #tpu.memory_space<vmem>>, %arg2: memref<8x64xf32, #tpu.memory_space<vmem>>, %arg3: memref<2x64xf32, #tpu.memory_space<vmem>>, %arg4: memref<2x64xf32, #tpu.memory_space<vmem>>, %arg5: memref<256x128xbf16, #tpu.memory_space<vmem>>, %arg6: memref<2x128xf32, #tpu.memory_space<vmem>>, %arg7: memref<128x2xf32, #tpu.memory_space<vmem>>) attributes {dimension_semantics = [#tpu.dimension_semantics<arbitrary>], iteration_bounds = array<i64: 1>, scalar_prefetch = 0 : i64, scratch_operands = 0 : i64, tpu.core_type = #tpu.core_type<tc>, window_params = [{pipeline_mode = #tpu.pipeline_mode<synchronous>, transform_indices = @transform_0, window_bounds = array<i64: 128, 8>}, {pipeline_mode = #tpu.pipeline_mode<synchronous>, transform_indices = @transform_1, window_bounds = array<i64: 8, 64>}, {pipeline_mode = #tpu.pipeline_mode<synchronous>, transform_indices = @transform_2, window_bounds = array<i64: 2, 64>}, {pipeline_mode = #tpu.pipeline_mode<synchronous>, transform_indices = @transform_3, window_bounds = array<i64: 2, 64>}, {pipeline_mode = #tpu.pipeline_mode<synchronous>, transform_indices = @transform_4, window_bounds = array<i64: 256, 128>}, {pipeline_mode = #tpu.pipeline_mode<synchronous>, transform_indices = @transform_5, window_bounds = array<i64: 2, 128>}, {pipeline_mode = #tpu.pipeline_mode<synchronous>, transform_indices = @transform_6, window_bounds = array<i64: 128, 2>}]} {
    %c0 = arith.constant 0 : index
    %c0_0 = arith.constant 0 : index
    %0 = vector.load %arg1[%c0, %c0_0] : memref<128x8xf32, #tpu.memory_space<vmem>>, vector<128x8xf32>
    %c0_1 = arith.constant 0 : index
    %c0_2 = arith.constant 0 : index
    %1 = vector.load %arg2[%c0_1, %c0_2] : memref<8x64xf32, #tpu.memory_space<vmem>>, vector<8x64xf32>
    %cst = arith.constant dense<0.000000e+00> : vector<128x64xf32>
    %2 = tpu.matmul %0, %1, %cst {dimension_numbers = #tpu.dot_dimension_numbers<[1], [0], [0], [1], [0, 0, 1, 1], [], []>} : vector<128x8xf32>, vector<8x64xf32>, vector<128x64xf32> -> vector<128x64xf32>
    %c0_3 = arith.constant 0 : index
    %c0_4 = arith.constant 0 : index
    %3 = vector.load %arg3[%c0_3, %c0_4] : memref<2x64xf32, #tpu.memory_space<vmem>>, vector<2x64xf32>
    %cst_5 = arith.constant dense<0.000000e+00> : vector<2x128xf32>
    %4 = tpu.matmul %3, %2, %cst_5 {dimension_numbers = #tpu.dot_dimension_numbers<[1], [1], [0], [0], [0, 0, 1, 0], [], []>} : vector<2x64xf32>, vector<128x64xf32>, vector<2x128xf32> -> vector<2x128xf32>
    %c0_6 = arith.constant 0 : index
    %c0_7 = arith.constant 0 : index
    %5 = vector.load %arg6[%c0_6, %c0_7] : memref<2x128xf32, #tpu.memory_space<vmem>>, vector<2x128xf32>
    tpu.vector_store %arg6[%c0_6, %c0_7], %4 {strides = array<i32>} : memref<2x128xf32, #tpu.memory_space<vmem>>, vector<2x128xf32>,
    %c0_8 = arith.constant 0 : index
    %c0_9 = arith.constant 0 : index
    %6 = vector.load %arg4[%c0_8, %c0_9] : memref<2x64xf32, #tpu.memory_space<vmem>>, vector<2x64xf32>
    %cst_10 = arith.constant dense<0.000000e+00> : vector<128x2xf32>
    %7 = tpu.matmul %2, %6, %cst_10 {dimension_numbers = #tpu.dot_dimension_numbers<[1], [1], [0], [0], [0, 0, 1, 0], [], []>} : vector<128x64xf32>, vector<2x64xf32>, vector<128x2xf32> -> vector<128x2xf32>
    %c0_11 = arith.constant 0 : index
    %c0_12 = arith.constant 0 : index
    %8 = vector.load %arg7[%c0_11, %c0_12] : memref<128x2xf32, #tpu.memory_space<vmem>>, vector<128x2xf32>
    tpu.vector_store %arg7[%c0_11, %c0_12], %7 {strides = array<i32>} : memref<128x2xf32, #tpu.memory_space<vmem>>, vector<128x2xf32>,
    %9 = arith.truncf %2 : vector<128x64xf32> to vector<128x64xbf16>
    %cst_13 = arith.constant 0.000000e+00 : bf16
    %10 = vector.broadcast %cst_13 : bf16 to vector<256x128xbf16>
    %c0_14 = arith.constant 0 : index
    %c0_15 = arith.constant 0 : index
    %11 = vector.load %arg5[%c0_14, %c0_15] : memref<256x128xbf16, #tpu.memory_space<vmem>>, vector<256x128xbf16>
    tpu.vector_store %arg5[%c0_14, %c0_15], %10 {strides = array<i32>} : memref<256x128xbf16, #tpu.memory_space<vmem>>, vector<256x128xbf16>,
    %12 = vector.extract_strided_slice %9 {offsets = [0, 0], sizes = [128, 32], strides = [1, 1]} : vector<128x64xbf16> to vector<128x32xbf16>
    %c0_16 = arith.constant 0 : index
    %c0_17 = arith.constant 0 : index
    %13 = vector.load %arg5[%c0_16, %c0_17] : memref<256x128xbf16, #tpu.memory_space<vmem>>, vector<128x32xbf16>
    tpu.vector_store %arg5[%c0_16, %c0_17], %12 {strides = array<i32>} : memref<256x128xbf16, #tpu.memory_space<vmem>>, vector<128x32xbf16>,
    %14 = vector.extract_strided_slice %9 {offsets = [0, 32], sizes = [128, 32], strides = [1, 1]} : vector<128x64xbf16> to vector<128x32xbf16>
    %c128 = arith.constant 128 : index
    %c32 = arith.constant 32 : index
    %15 = vector.load %arg5[%c128, %c32] : memref<256x128xbf16, #tpu.memory_space<vmem>>, vector<128x32xbf16>
    tpu.vector_store %arg5[%c128, %c32], %14 {strides = array<i32>} : memref<256x128xbf16, #tpu.memory_space<vmem>>, vector<128x32xbf16>,
    return
  }
  func.func @transform_0(%arg0: i32) -> (i32, i32) {
    %c0_i32 = arith.constant 0 : i32
    %c0_i32_0 = arith.constant 0 : i32
    %c0_i32_1 = arith.constant 0 : i32
    return %c0_i32, %c0_i32_0 : i32, i32
  }
  func.func @transform_1(%arg0: i32) -> (i32, i32) {
    %c0_i32 = arith.constant 0 : i32
    %c0_i32_0 = arith.constant 0 : i32
    %c0_i32_1 = arith.constant 0 : i32
    return %c0_i32, %c0_i32_0 : i32, i32
  }
  func.func @transform_2(%arg0: i32) -> (i32, i32) {
    %c0_i32 = arith.constant 0 : i32
    %c0_i32_0 = arith.constant 0 : i32
    %c0_i32_1 = arith.constant 0 : i32
    return %c0_i32, %c0_i32_0 : i32, i32
  }
  func.func @transform_3(%arg0: i32) -> (i32, i32) {
    %c0_i32 = arith.constant 0 : i32
    %c0_i32_0 = arith.constant 0 : i32
    %c0_i32_1 = arith.constant 0 : i32
    return %c0_i32, %c0_i32_0 : i32, i32
  }
  func.func @transform_4(%arg0: i32) -> (i32, i32) {
    %c0_i32 = arith.constant 0 : i32
    %c0_i32_0 = arith.constant 0 : i32
    %c0_i32_1 = arith.constant 0 : i32
    return %c0_i32, %c0_i32_0 : i32, i32
  }
  func.func @transform_5(%arg0: i32) -> (i32, i32) {
    %c0_i32 = arith.constant 0 : i32
    %c0_i32_0 = arith.constant 0 : i32
    %c0_i32_1 = arith.constant 0 : i32
    return %c0_i32, %c0_i32_0 : i32, i32
  }
  func.func @transform_6(%arg0: i32) -> (i32, i32) {
    %c0_i32 = arith.constant 0 : i32
    %c0_i32_0 = arith.constant 0 : i32
    %c0_i32_1 = arith.constant 0 : i32
    return %c0_i32, %c0_i32_0 : i32, i32
  }
}

</mosaic_0001>

<bundles_post_ra>
// kernel: tpu_custom_call.1
= control target key start
LH: loop header
LB: loop body
LE: loop exit
PB: predicated region body
PF: predicated region fallthrough
CT: control target
= control target key end

     0   :  { %12 = vsyncpa [#allocation3], 0  ;;  %vm40_vm0 = vcmask 64512   ;;  %vm235_vm1 = vcmask 523264   ;;  %s1281_s0 = inlined_call_operand.vmem [shape: f32[128,8], index: 0, kind: input, shape index: {}]   ;;  %s1282_s1 = inlined_call_operand.vmem [shape: f32[8,64], index: 1, kind: input, shape index: {}]   ;;  %s1283_s2 = inlined_call_operand.vmem [shape: f32[2,64], index: 2, kind: input, shape index: {}]   ;;  %s1284_s3 = inlined_call_operand.vmem [shape: f32[2,64], index: 3, kind: input, shape index: {}]   ;;  %s1285_s4 = inlined_call_operand.hbm [shape: bf16[256,128], index: 4, kind: output, shape index: {0}]   ;;  %s1286_s5 = inlined_call_operand.hbm [shape: f32[2,128], index: 5, kind: output, shape index: {1}]   ;;  %s1287_s6 = inlined_call_operand.vmem [shape: f32[128,2], index: 6, kind: output, shape index: {2}]  }
   0x1   :  { %v39_v0 = vld [vmem:[%s1282_s1] sm:$0xff]  ;;  %v24_v2 = vld [vmem:[%s1281_s0 + $0x8] sm:$0xff]  ;;  %v25_v3 = vld [vmem:[%s1281_s0 + $0x10] sm:$0xff] }
   0x2   :  { %v23_v1 = vld [vmem:[%s1281_s0] sm:$0xff]  ;;  %821 = vmatprep.subr.mxu0 %v39_v0  ;;  %v26_v4 = vld [vmem:[%s1281_s0 + $0x18] sm:$0xff] }
   0x3   :  { %823 = vmatprep.mubr.msk.f32.mxu0 %vm40_vm0, %v23_v1  ;;  %822 = vmatpush3.msra.mxu0 %v39_v0  ;;  %v27_v5 = vld [vmem:[%s1281_s0 + $0x20] sm:$0xff] }
   0x4   :  { %824 = vmatmul.mubr.msk.f32.vlgmr.msra.gmra.mrb[0].mxu0 %vm40_vm0, %v24_v2  ;;  %v358_v6 = vld [vmem:[%s1284_s3] sm:$0x3] }
   0x5   :  { %826 = vmatprep.mubr.msk.f32.mxu0 %vm40_vm0, %v25_v3  ;;  %882 = vmatprep.subr.msk.mxu0 %vm235_vm1, %v358_v6 }
   0x6   :  { %13 = vsyncpa [#allocation5], 0  ;;  %v28_v7 = vld [vmem:[%s1281_s0 + $0x28] sm:$0xff]  ;;  %v29_v8 = vld [vmem:[%s1281_s0 + $0x30] sm:$0xff]  ;;  %v996_v18 = vmov 0   ;;  %v997_v19 = vmov 0.0|0.0  }
   0x7   :  { %v30_v9 = vld [vmem:[%s1281_s0 + $0x38] sm:$0xff]  ;;  %v31_v10 = vld [vmem:[%s1281_s0 + $0x40] sm:$0xff]  ;;  %v32_v11 = vld [vmem:[%s1281_s0 + $0x48] sm:$0xff]  ;;  %533 = vst [vmem:[#allocation2 + $0x4] sm:$0xf] %v996_v18  ;;  %908 = vmatprep.subr.bf16.mxu1 %v997_v19  ;;  %vm998_vm2 = vmmov 0  }
   0x8   :  { %827 = vmatmul.mubr.msk.f32.gmra.mrb[2].mxu0 %vm40_vm0, %v26_v4  ;;  %v33_v12 = vld [vmem:[%s1281_s0 + $0x50] sm:$0xff]  ;;  %v34_v13 = vld [vmem:[%s1281_s0 + $0x58] sm:$0xff]  ;;  %v35_v14 = vld [vmem:[%s1281_s0 + $0x60] sm:$0xff]  ;;  %549 = vst [vmem:[#allocation2 + $0x44] sm:$0xf] %v996_v18  ;;  %v999_v20 = vmov 0.0  }
   0x9   :  { %829 = vmatprep.mubr.msk.f32.mxu0 %vm40_vm0, %v27_v5  ;;  %v36_v15 = vld [vmem:[%s1281_s0 + $0x68] sm:$0xff]  ;;  %v37_v16 = vld [vmem:[%s1281_s0 + $0x70] sm:$0xff]  ;;  %v38_v17 = vld [vmem:[%s1281_s0 + $0x78] sm:$0xff]  ;;  %532 = vst [vmem:[#allocation2] sm:$0xf] %v996_v18  ;;  %879 = vmatprep.mubr.msk.f32.mxu1 %vm998_vm2, %v999_v20  ;;  %vm620_vm3 = vcmask 257024  }
   0xa   :  { %883 = vmatpush3.xpose.msk.msra.mxu0 %vm235_vm1, %v358_v6  ;;  %534 = vst [vmem:[#allocation2 + $0x8] sm:$0xf] %v996_v18  ;;  %535 = vst [vmem:[#allocation2 + $0xc] sm:$0xf] %v996_v18  ;;  %vm637_vm4 = vcmask 519424   ;;  %s1000_s7 = smov [#allocation2]  }
   0xb   :  { %536 = vst [vmem:[#allocation2 + $0x10] sm:$0xf] %v996_v18  ;;  %537 = vst [vmem:[#allocation2 + $0x14] sm:$0xf] %v996_v18  ;;  %v234_v62 = vld [vmem:[%s1283_s2] sm:$0x3] }
   0xc   :  { %830 = vmatmul.mubr.msk.f32.gmra.mrb[4].mxu0 %vm40_vm0, %v28_v7  ;;  %538 = vst [vmem:[#allocation2 + $0x18] sm:$0xf] %v996_v18  ;;  %539 = vst [vmem:[#allocation2 + $0x1c] sm:$0xf] %v996_v18  ;;  %s659_s8 = sshll.u32 %s1000_s7, 4  ;;  %s660_s8 = int_to_ptr.vmem [resolvable:$true] %s659_s8 }
   0xd   :  { %832 = vmatprep.mubr.msk.f32.mxu0 %vm40_vm0, %v29_v8  ;;  %540 = vst [vmem:[#allocation2 + $0x20] sm:$0xf] %v996_v18  ;;  %541 = vst [vmem:[#allocation2 + $0x24] sm:$0xf] %v996_v18  ;;  %s948_s9 = scalar_lea.vmem %s660_s8, 2048  ;;  %p953_p1 = scmp.lt.s32.totalorder %s660_s8, %s660_s8 }
   0xe   :  { %542 = vst [vmem:[#allocation2 + $0x28] sm:$0xf] %v996_v18  ;;  %543 = vst [vmem:[#allocation2 + $0x2c] sm:$0xf] %v996_v18  ;;  %p949_p0 = scmp.ne.s32.totalorder %s660_s8, %s948_s9  ;;  %p954_p2 = scmp.lt.s32.totalorder %s948_s9, %s948_s9 }
   0xf   :  { %544 = vst [vmem:[#allocation2 + $0x30] sm:$0xf] %v996_v18  ;;  %545 = vst [vmem:[#allocation2 + $0x34] sm:$0xf] %v996_v18 }
  0x10   :  { %833 = vmatmul.mubr.msk.f32.gmra.mrb[6].mxu0 %vm40_vm0, %v30_v9  ;;  %546 = vst [vmem:[#allocation2 + $0x38] sm:$0xf] %v996_v18  ;;  %547 = vst [vmem:[#allocation2 + $0x3c] sm:$0xf] %v996_v18  ;;  %p955_p3 = por %p954_p2, %p953_p1 }
  0x11   :  { %835 = vmatprep.mubr.msk.f32.mxu0 %vm40_vm0, %v31_v10  ;;  %548 = vst [vmem:[#allocation2 + $0x40] sm:$0xf] %v996_v18  ;;  %550 = vst [vmem:[#allocation2 + $0x48] sm:$0xf] %v996_v18 }
  0x12   :  { %551 = vst [vmem:[#allocation2 + $0x4c] sm:$0xf] %v996_v18  ;;  %552 = vst [vmem:[#allocation2 + $0x50] sm:$0xf] %v996_v18  ;;  %p956_p4 = pnand %p955_p3, %p949_p0 }
  0x13   :  { %553 = vst [vmem:[#allocation2 + $0x54] sm:$0xf] %v996_v18  ;;  %554 = vst [vmem:[#allocation2 + $0x58] sm:$0xf] %v996_v18 }
  0x14   :  { %836 = vmatmul.mubr.msk.f32.gmra.mrb[8].mxu0 %vm40_vm0, %v32_v11  ;;  %555 = vst [vmem:[#allocation2 + $0x5c] sm:$0xf] %v996_v18  ;;  %556 = vst [vmem:[#allocation2 + $0x60] sm:$0xf] %v996_v18 }
  0x15   :  { %838 = vmatprep.mubr.msk.f32.mxu0 %vm40_vm0, %v33_v12  ;;  %557 = vst [vmem:[#allocation2 + $0x64] sm:$0xf] %v996_v18  ;;  %558 = vst [vmem:[#allocation2 + $0x68] sm:$0xf] %v996_v18 }
  0x16   :  { %559 = vst [vmem:[#allocation2 + $0x6c] sm:$0xf] %v996_v18  ;;  %560 = vst [vmem:[#allocation2 + $0x70] sm:$0xf] %v996_v18 }
  0x17   :  { %561 = vst [vmem:[#allocation2 + $0x74] sm:$0xf] %v996_v18  ;;  %562 = vst [vmem:[#allocation2 + $0x78] sm:$0xf] %v996_v18 }
  0x18   :  { %839 = vmatmul.mubr.msk.f32.gmra.mrb[10].mxu0 %vm40_vm0, %v34_v13  ;;  %563 = vst [vmem:[#allocation2 + $0x7c] sm:$0xf] %v996_v18  ;;  %vm1114_vm5 = vmpackc.low %vm235_vm1, %vm235_vm1 }
  0x19   :  { %841 = vmatprep.mubr.msk.f32.mxu0 %vm40_vm0, %v35_v14 }
  0x1c   :  { %842 = vmatmul.mubr.msk.f32.gmra.mrb[12].mxu0 %vm40_vm0, %v36_v15 }
  0x1d   :  { %844 = vmatprep.mubr.msk.f32.mxu0 %vm40_vm0, %v37_v16 }
  0x20   :  { %845 = vmatmul.mubr.msk.f32.gmra.mrb[14].mxu0 %vm40_vm0, %v38_v17 }
  0xd7   :  { %v825_v21 = vpop.f32.mrb[0].mxu0 }
  0xd8   :  { %v755_v22 = vpack.c.bf16 %v825_v21, %v825_v21  ;;  %v155_v23 = vpop.f32.mrb[1].mxu0 }
  0xd9   :  { %v909_v25 = vpack.c.bf16 %v825_v21, %v155_v23  ;;  %v754_v26 = vpack.c.bf16 %v155_v23, %v155_v23  ;;  %884 = vmatprep.mubr.msk.f32.mxu0 %vm235_vm1, %v155_v23 }
  0xda   :  { %622 = vst.msk [vmem:[#allocation2 + $0x4] sm:$0xf] %vm620_vm3, %v755_v22  ;;  %885 = vmatmul.mubr.msk.f32.vlgmr.msra.gmra.mrb[16].mxu0 %vm235_vm1, %v825_v21 }
  0xdb   :  { %639 = vst.msk [vmem:[#allocation2 + $0x44] sm:$0xf] %vm637_vm4, %v755_v22  ;;  %638 = vst.msk [vmem:[#allocation2 + $0x40] sm:$0xf] %vm637_vm4, %v754_v26  ;;  %911 = vmatpush3.bf16.xpose.msk.msra.mxu1 %vm1114_vm5, %v909_v25  ;;  %v828_v27 = vpop.f32.mrb[2].mxu0 }
  0xdc   :  { %621 = vst.msk [vmem:[#allocation2] sm:$0xf] %vm620_vm3, %v754_v26  ;;  %v757_v28 = vpack.c.bf16 %v828_v27, %v828_v27  ;;  %v165_v29 = vpop.f32.mrb[3].mxu0  ;;  %912 = vmatprep.subr.bf16.mxu1 %v997_v19 }
  0xdd   :  { %v913_v30 = vpack.c.bf16 %v828_v27, %v165_v29  ;;  %v756_v31 = vpack.c.bf16 %v165_v29, %v165_v29  ;;  %887 = vmatprep.mubr.msk.f32.mxu0 %vm235_vm1, %v165_v29 }
  0xde   :  { %624 = vst.msk [vmem:[#allocation2 + $0xc] sm:$0xf] %vm620_vm3, %v757_v28  ;;  %888 = vmatmul.mubr.msk.f32.gmra.mrb[18].mxu0 %vm235_vm1, %v828_v27 }
  0xdf   :  { %641 = vst.msk [vmem:[#allocation2 + $0x4c] sm:$0xf] %vm637_vm4, %v757_v28  ;;  %640 = vst.msk [vmem:[#allocation2 + $0x48] sm:$0xf] %vm637_vm4, %v756_v31  ;;  %v831_v32 = vpop.f32.mrb[4].mxu0 }
  0xe0   :  { %623 = vst.msk [vmem:[#allocation2 + $0x8] sm:$0xf] %vm620_vm3, %v756_v31  ;;  %v759_v33 = vpack.c.bf16 %v831_v32, %v831_v32  ;;  %v175_v34 = vpop.f32.mrb[5].mxu0 }
  0xe1   :  { %v917_v35 = vpack.c.bf16 %v831_v32, %v175_v34  ;;  %v758_v36 = vpack.c.bf16 %v175_v34, %v175_v34  ;;  %890 = vmatprep.mubr.msk.f32.mxu0 %vm235_vm1, %v175_v34 }
  0xe2   :  { %626 = vst.msk [vmem:[#allocation2 + $0x14] sm:$0xf] %vm620_vm3, %v759_v33  ;;  %891 = vmatmul.mubr.msk.f32.gmra.mrb[20].mxu0 %vm235_vm1, %v831_v32 }
  0xe3   :  { %643 = vst.msk [vmem:[#allocation2 + $0x54] sm:$0xf] %vm637_vm4, %v759_v33  ;;  %915 = vmatpush3.bf16.xpose.msk.msra.mxu1 %vm1114_vm5, %v913_v30  ;;  %642 = vst.msk [vmem:[#allocation2 + $0x50] sm:$0xf] %vm637_vm4, %v758_v36  ;;  %v834_v37 = vpop.f32.mrb[6].mxu0 }
  0xe4   :  { %625 = vst.msk [vmem:[#allocation2 + $0x10] sm:$0xf] %vm620_vm3, %v758_v36  ;;  %916 = vmatprep.subr.bf16.mxu1 %v997_v19  ;;  %v761_v38 = vpack.c.bf16 %v834_v37, %v834_v37  ;;  %v185_v39 = vpop.f32.mrb[7].mxu0 }
  0xe5   :  { %v921_v40 = vpack.c.bf16 %v834_v37, %v185_v39  ;;  %v760_v41 = vpack.c.bf16 %v185_v39, %v185_v39  ;;  %893 = vmatprep.mubr.msk.f32.mxu0 %vm235_vm1, %v185_v39 }
  0xe6   :  { %628 = vst.msk [vmem:[#allocation2 + $0x1c] sm:$0xf] %vm620_vm3, %v761_v38  ;;  %894 = vmatmul.mubr.msk.f32.gmra.mrb[22].mxu0 %vm235_vm1, %v834_v37 }
  0xe7   :  { %645 = vst.msk [vmem:[#allocation2 + $0x5c] sm:$0xf] %vm637_vm4, %v761_v38  ;;  %644 = vst.msk [vmem:[#allocation2 + $0x58] sm:$0xf] %vm637_vm4, %v760_v41  ;;  %v837_v42 = vpop.f32.mrb[8].mxu0 }
  0xe8   :  { %627 = vst.msk [vmem:[#allocation2 + $0x18] sm:$0xf] %vm620_vm3, %v760_v41  ;;  %v763_v43 = vpack.c.bf16 %v837_v42, %v837_v42  ;;  %v195_v44 = vpop.f32.mrb[9].mxu0 }
  0xe9   :  { %v925_v45 = vpack.c.bf16 %v837_v42, %v195_v44  ;;  %v762_v46 = vpack.c.bf16 %v195_v44, %v195_v44  ;;  %896 = vmatprep.mubr.msk.f32.mxu0 %vm235_vm1, %v195_v44 }
  0xea   :  { %630 = vst.msk [vmem:[#allocation2 + $0x24] sm:$0xf] %vm620_vm3, %v763_v43  ;;  %897 = vmatmul.mubr.msk.f32.gmra.mrb[24].mxu0 %vm235_vm1, %v837_v42 }
  0xeb   :  { %647 = vst.msk [vmem:[#allocation2 + $0x64] sm:$0xf] %vm637_vm4, %v763_v43  ;;  %919 = vmatpush3.bf16.xpose.msk.msra.mxu1 %vm1114_vm5, %v917_v35  ;;  %646 = vst.msk [vmem:[#allocation2 + $0x60] sm:$0xf] %vm637_vm4, %v762_v46  ;;  %v840_v47 = vpop.f32.mrb[10].mxu0 }
  0xec   :  { %629 = vst.msk [vmem:[#allocation2 + $0x20] sm:$0xf] %vm620_vm3, %v762_v46  ;;  %920 = vmatprep.subr.bf16.mxu1 %v997_v19  ;;  %v765_v48 = vpack.c.bf16 %v840_v47, %v840_v47  ;;  %v205_v49 = vpop.f32.mrb[11].mxu0 }
  0xed   :  { %v929_v50 = vpack.c.bf16 %v840_v47, %v205_v49  ;;  %v764_v51 = vpack.c.bf16 %v205_v49, %v205_v49  ;;  %899 = vmatprep.mubr.msk.f32.mxu0 %vm235_vm1, %v205_v49 }
  0xee   :  { %632 = vst.msk [vmem:[#allocation2 + $0x2c] sm:$0xf] %vm620_vm3, %v765_v48  ;;  %900 = vmatmul.mubr.msk.f32.gmra.mrb[26].mxu0 %vm235_vm1, %v840_v47 }
  0xef   :  { %649 = vst.msk [vmem:[#allocation2 + $0x6c] sm:$0xf] %vm637_vm4, %v765_v48  ;;  %648 = vst.msk [vmem:[#allocation2 + $0x68] sm:$0xf] %vm637_vm4, %v764_v51  ;;  %v843_v52 = vpop.f32.mrb[12].mxu0 }
  0xf0   :  { %631 = vst.msk [vmem:[#allocation2 + $0x28] sm:$0xf] %vm620_vm3, %v764_v51  ;;  %v767_v53 = vpack.c.bf16 %v843_v52, %v843_v52  ;;  %v215_v54 = vpop.f32.mrb[13].mxu0 }
  0xf1   :  { %v933_v55 = vpack.c.bf16 %v843_v52, %v215_v54  ;;  %v766_v56 = vpack.c.bf16 %v215_v54, %v215_v54  ;;  %902 = vmatprep.mubr.msk.f32.mxu0 %vm235_vm1, %v215_v54 }
  0xf2   :  { %634 = vst.msk [vmem:[#allocation2 + $0x34] sm:$0xf] %vm620_vm3, %v767_v53  ;;  %903 = vmatmul.mubr.msk.f32.gmra.mrb[28].mxu0 %vm235_vm1, %v843_v52 }
  0xf3   :  { %651 = vst.msk [vmem:[#allocation2 + $0x74] sm:$0xf] %vm637_vm4, %v767_v53  ;;  %923 = vmatpush3.bf16.xpose.msk.msra.mxu1 %vm1114_vm5, %v921_v40  ;;  %650 = vst.msk [vmem:[#allocation2 + $0x70] sm:$0xf] %vm637_vm4, %v766_v56  ;;  %v846_v57 = vpop.f32.mrb[14].mxu0 }
  0xf4   :  { %633 = vst.msk [vmem:[#allocation2 + $0x30] sm:$0xf] %vm620_vm3, %v766_v56  ;;  %924 = vmatprep.subr.bf16.mxu1 %v997_v19  ;;  %v769_v58 = vpack.c.bf16 %v846_v57, %v846_v57  ;;  %v225_v59 = vpop.f32.mrb[15].mxu0 }
  0xf5   :  { %v937_v60 = vpack.c.bf16 %v846_v57, %v225_v59  ;;  %v768_v61 = vpack.c.bf16 %v225_v59, %v225_v59  ;;  %905 = vmatprep.mubr.msk.f32.mxu0 %vm235_vm1, %v225_v59 }
  0xf6   :  { %636 = vst.msk [vmem:[#allocation2 + $0x3c] sm:$0xf] %vm620_vm3, %v769_v58  ;;  %906 = vmatmul.mubr.msk.f32.gmra.mrb[30].mxu0 %vm235_vm1, %v846_v57 }
  0xf7   :  { %653 = vst.msk [vmem:[#allocation2 + $0x7c] sm:$0xf] %vm637_vm4, %v769_v58  ;;  %652 = vst.msk [vmem:[#allocation2 + $0x78] sm:$0xf] %vm637_vm4, %v768_v61 }
  0xf8   :  { %635 = vst.msk [vmem:[#allocation2 + $0x38] sm:$0xf] %vm620_vm3, %v768_v61 }
  0xfb   :  { %927 = vmatpush3.bf16.xpose.msk.msra.mxu1 %vm1114_vm5, %v925_v45 }
  0xfc   :  { %928 = vmatprep.subr.bf16.mxu1 %v997_v19 }
 0x103   :  { %931 = vmatpush3.bf16.xpose.msk.msra.mxu1 %vm1114_vm5, %v929_v50 }
 0x104   :  { %932 = vmatprep.subr.bf16.mxu1 %v997_v19 }
 0x10b   :  { %935 = vmatpush3.bf16.xpose.msk.msra.mxu1 %vm1114_vm5, %v933_v55 }
 0x10c   :  { %936 = vmatprep.subr.bf16.mxu1 %v997_v19 }
 0x113   :  { %939 = vmatpush3.bf16.xpose.msk.msra.mxu1 %vm1114_vm5, %v937_v60 }
 0x11a   :  { %880 = vmatmul.mubr.msk.f32.vlgmr.msra.gmra.mrb[0].mxu1 %vm235_vm1, %v234_v62 }
 0x11b   :  { %959 = shalt.err (!%p956_p4)
}
 0x11c   :  { %s960_s12 = scalar_lea.hbm %s1285_s4, 2048 }
 0x11d   :  { %p961_p5 = scmp.ne.s32.totalorder %s1285_s4, %s960_s12  ;;  %p964_p6 = scmp.lt.u32.totalorder %s960_s12, %s1285_s4 }
 0x11f   :  { %p966_p7 = pnand %p964_p6, %p961_p5 }
 0x121   :  { %969 = shalt.err (!%p966_p7)
}
 0x122   :  { %s1001_s15 = smov 64   ;;  %s1002_s16 = smov 4   ;;  %vm507_vm6 = vcmask 15360  }
 0x123   :  { %665 = dma.vmem_to_hbm [thread:$0]  %s660_s8, 2048, %s1285_s4, [#allocation3], %s1001_s15, %s1001_s15, %s1002_s16  }
 0x124   :  { %s1003_s22 = smov [#allocation4]  }
 0x125   :  { %s672_s23 = sshll.u32 %s1003_s22, 4  ;;  %s673_s23 = int_to_ptr.vmem [resolvable:$true] %s672_s23 }
 0x126   :  { %s970_s24 = scalar_lea.vmem %s673_s23, 32  ;;  %p975_p9 = scmp.lt.s32.totalorder %s673_s23, %s673_s23 }
 0x127   :  { %p971_p8 = scmp.ne.s32.totalorder %s673_s23, %s970_s24  ;;  %p976_p10 = scmp.lt.s32.totalorder %s970_s24, %s970_s24 }
 0x129   :  { %p977_p11 = por %p976_p10, %p975_p9 }
 0x12b   :  { %p978_p12 = pnand %p977_p11, %p971_p8 }
 0x1ad   :  { %v886_v63 = vpop.f32.mrb[16].mxu0 }
 0x1ae   :  { %509 = vst.msk [vmem:[%s1287_s6 + $0x8] sm:$0xff] %vm507_vm6, %v886_v63  ;;  %v428_v0 = vpop.f32.mrb[17].mxu0 }
 0x1af   :  { %508 = vst.msk [vmem:[%s1287_s6] sm:$0xff] %vm507_vm6, %v428_v0 }
 0x1b1   :  { %v889_v1 = vpop.f32.mrb[18].mxu0 }
 0x1b2   :  { %511 = vst.msk [vmem:[%s1287_s6 + $0x18] sm:$0xff] %vm507_vm6, %v889_v1  ;;  %v438_v2 = vpop.f32.mrb[19].mxu0 }
 0x1b3   :  { %510 = vst.msk [vmem:[%s1287_s6 + $0x10] sm:$0xff] %vm507_vm6, %v438_v2 }
 0x1b5   :  { %v892_v3 = vpop.f32.mrb[20].mxu0 }
 0x1b6   :  { %513 = vst.msk [vmem:[%s1287_s6 + $0x28] sm:$0xff] %vm507_vm6, %v892_v3  ;;  %v448_v4 = vpop.f32.mrb[21].mxu0 }
 0x1b7   :  { %512 = vst.msk [vmem:[%s1287_s6 + $0x20] sm:$0xff] %vm507_vm6, %v448_v4 }
 0x1b9   :  { %v895_v5 = vpop.f32.mrb[22].mxu0 }
 0x1ba   :  { %515 = vst.msk [vmem:[%s1287_s6 + $0x38] sm:$0xff] %vm507_vm6, %v895_v5  ;;  %v458_v6 = vpop.f32.mrb[23].mxu0 }
 0x1bb   :  { %514 = vst.msk [vmem:[%s1287_s6 + $0x30] sm:$0xff] %vm507_vm6, %v458_v6 }
 0x1bd   :  { %v898_v7 = vpop.f32.mrb[24].mxu0 }
 0x1be   :  { %517 = vst.msk [vmem:[%s1287_s6 + $0x48] sm:$0xff] %vm507_vm6, %v898_v7  ;;  %v468_v8 = vpop.f32.mrb[25].mxu0 }
 0x1bf   :  { %516 = vst.msk [vmem:[%s1287_s6 + $0x40] sm:$0xff] %vm507_vm6, %v468_v8 }
 0x1c1   :  { %v901_v9 = vpop.f32.mrb[26].mxu0 }
 0x1c2   :  { %519 = vst.msk [vmem:[%s1287_s6 + $0x58] sm:$0xff] %vm507_vm6, %v901_v9  ;;  %v478_v10 = vpop.f32.mrb[27].mxu0 }
 0x1c3   :  { %518 = vst.msk [vmem:[%s1287_s6 + $0x50] sm:$0xff] %vm507_vm6, %v478_v10 }
 0x1c5   :  { %v904_v11 = vpop.f32.mrb[28].mxu0 }
 0x1c6   :  { %521 = vst.msk [vmem:[%s1287_s6 + $0x68] sm:$0xff] %vm507_vm6, %v904_v11  ;;  %v488_v12 = vpop.f32.mrb[29].mxu0 }
 0x1c7   :  { %520 = vst.msk [vmem:[%s1287_s6 + $0x60] sm:$0xff] %vm507_vm6, %v488_v12 }
 0x1c9   :  { %v907_v13 = vpop.f32.mrb[30].mxu0 }
 0x1ca   :  { %523 = vst.msk [vmem:[%s1287_s6 + $0x78] sm:$0xff] %vm507_vm6, %v907_v13  ;;  %v498_v14 = vpop.f32.mrb[31].mxu0 }
 0x1cb   :  { %522 = vst.msk [vmem:[%s1287_s6 + $0x70] sm:$0xff] %vm507_vm6, %v498_v14 }
 0x1ed   :  { %v353_v15 = vpop.f32.mrb[0].mxu1 }
 0x1ee   :  { %357 = vst [vmem:[#allocation4] sm:$0x3] %v353_v15  ;;  %v881_v16 = vpop.f32.mrb[1].mxu1 }
 0x1ef   :  { %981 = shalt.err (!%p978_p12)
}
 0x1f0   :  { %s982_s26 = scalar_lea.hbm %s1286_s5, 32 }
 0x1f1   :  { %p983_p13 = scmp.ne.s32.totalorder %s1286_s5, %s982_s26  ;;  %p986_p0 = scmp.lt.u32.totalorder %s982_s26, %s1286_s5 }
 0x1f3   :  { %p988_p1 = pnand %p986_p0, %p983_p13 }
 0x1f5   :  { %991 = shalt.err (!%p988_p1)
}
 0x1f6   :  { %675 = dma.vmem_to_hbm [thread:$0]  %s673_s23, 32, %s1286_s5, [#allocation5]  }
 0x1f7   :  { %992 = dma.done.wait [#allocation3], 2048  }
 0x1f8   :  { %993 = vsyncadd [#allocation3], 4294965248 }
 0x1f9   :  { %994 = dma.done.wait [#allocation5], 32  }
 0x1fa   :  { %995 = vsyncadd [#allocation5], 4294967264 }
 0x1fb   :  { %686 = vsyncpa [#allocation3], 1 }
 0x1fc   :  { %687 = vsyncpa [#allocation5], 1 }

</bundles_post_ra>
